<compile_context>
chip_gen: v7x
topology: tpu7x:2x2x1
jax: 0.10.0
libtpu: 0.0.40
codegen_flags: <defaults>
</compile_context>

<pallas_src>
import jax
import jax.numpy as jnp
from jax.experimental import pallas as pl
from jax.experimental.pallas import tpu as pltpu


# ----------------------------- Pallas kernels ------------------------------

def stats_kernel(x_ref, w_ref, sum_ref, ssq_ref):
    """Accumulate per-output-channel sum / sum-of-squares of y = W @ x.

    x_ref: (1, Cin, thw)   w_ref: (Cout, Cin)
    sum_ref, ssq_ref: (Cout, 1) outputs mapped to the same block for every grid
    step -> they stay resident in VMEM and act as accumulators.
    """
    first = jnp.logical_and(pl.program_id(0) == 0, pl.program_id(1) == 0)

    @pl.when(first)
    def _():
        sum_ref[...] = jnp.zeros_like(sum_ref)
        ssq_ref[...] = jnp.zeros_like(ssq_ref)

    y = jnp.dot(w_ref[...], x_ref[0], preferred_element_type=jnp.float32)  # (Cout, thw)
    sum_ref[...] += jnp.sum(y, axis=1, keepdims=True)
    ssq_ref[...] += jnp.sum(y * y, axis=1, keepdims=True)


def conv_bn_relu_kernel(x_ref, w_ref, scale_ref, shift_ref, o_ref):
    """Recompute the 1x1 conv tile and apply folded BN (scale/shift) + ReLU.

    x_ref: (1, Cin, thw)  w_ref: (Cout, Cin)  scale/shift: (Cout, 1)
    o_ref: (1, Cout, thw)   -- lane-dense output block (thw multiple of 128).
    """
    y = jnp.dot(w_ref[...], x_ref[0], preferred_element_type=jnp.float32)  # (Cout, thw)
    o_ref[0] = jnp.maximum(y * scale_ref[...] + shift_ref[...], 0.0).astype(o_ref.dtype)


# ------------------------------ wrapper ------------------------------------

def _pick_hw_tile(hw, max_tile=2048):
    """Largest lane-dense tile of the H*W axis that divides it (full extent if small)."""
    if hw <= max_tile:
        return hw  # full-extent block is always a legal block dim
    for t in range(max_tile, 127, -128):
        if hw % t == 0:
            return t
    # TODO(synk): ragged H*W (no 128-multiple divisor) falls back to one big block.
    return hw


def fcu_forward(x_nchw, w, b, gamma, beta, *, eps=1e-6):
    """x_nchw: (N, Cin, H, W); w: (Cout, Cin); b/gamma/beta: (Cout,)."""
    del b  # conv bias cancels exactly under batch-statistics BatchNorm
    N, Cin, H, W = x_nchw.shape
    Cout = w.shape[0]
    HW = H * W
    M = N * HW
    thw = _pick_hw_tile(HW)
    grid = (N, HW // thw)

    x3d = x_nchw.reshape(N, Cin, HW).astype(jnp.float32)   # zero-copy reshape
    w2d = w.astype(jnp.float32)                             # (Cout, Cin)

    x_spec = pl.BlockSpec((1, Cin, thw), lambda n, j: (n, 0, j))
    w_spec = pl.BlockSpec((Cout, Cin), lambda n, j: (0, 0))
    vec_spec = pl.BlockSpec((Cout, 1), lambda n, j: (0, 0))

    # Pass 1: per-channel batch statistics of the conv output (never materialized).
    sum_y, ssq_y = pl.pallas_call(
        stats_kernel,
        out_shape=(jax.ShapeDtypeStruct((Cout, 1), jnp.float32),
                   jax.ShapeDtypeStruct((Cout, 1), jnp.float32)),
        grid_spec=pltpu.PrefetchScalarGridSpec(
            num_scalar_prefetch=0,
            grid=grid,
            in_specs=[x_spec, w_spec],
            out_specs=[vec_spec, vec_spec]),
        compiler_params=pltpu.CompilerParams(
            dimension_semantics=("arbitrary", "arbitrary")),
    )(x3d, w2d)

    # Fold BN (biased batch variance, computed as E[y^2] - mean^2) + affine into
    # a single per-channel scale/shift, hoisted out of the per-tile work.
    mean = sum_y / M                                  # (Cout, 1)
    var = ssq_y / M - mean * mean                     # (Cout, 1)
    scale = gamma.reshape(Cout, 1).astype(jnp.float32) * jax.lax.rsqrt(var + eps)
    shift = beta.reshape(Cout, 1).astype(jnp.float32) - mean * scale

    # Pass 2: fused conv + BN + ReLU, tiled & pipelined over (N, H*W).
    out3d = pl.pallas_call(
        conv_bn_relu_kernel,
        out_shape=jax.ShapeDtypeStruct((N, Cout, HW), jnp.float32),
        grid_spec=pltpu.PrefetchScalarGridSpec(
            num_scalar_prefetch=0,
            grid=grid,
            in_specs=[x_spec, w_spec, vec_spec, vec_spec],
            out_specs=pl.BlockSpec((1, Cout, thw), lambda n, j: (n, 0, j))),
        compiler_params=pltpu.CompilerParams(
            dimension_semantics=("parallel", "parallel")),
    )(x3d, w2d, scale, shift)

    return out3d.reshape(N, Cout, H, W)                # zero-copy reshape back to NCHW


# ------------------------- pure-JAX reference ------------------------------

def fcu_reference(x, w, b, gamma, beta, eps=1e-6):
    y = jnp.einsum("nchw,oc->nohw", x, w) + b[None, :, None, None]
    mean = y.mean(axis=(0, 2, 3), keepdims=True)
    var = ((y - mean) ** 2).mean(axis=(0, 2, 3), keepdims=True)
    y_hat = (y - mean) / jnp.sqrt(var + eps)
    return jnp.maximum(
        y_hat * gamma[None, :, None, None] + beta[None, :, None, None], 0.0
    )


# --------------------------------- main -------------------------------------

if __name__ == "__main__":
    key = jax.random.PRNGKey(0)
    k_x, k_w, k_b, k_g, k_beta = jax.random.split(key, 5)

    N, Cin, H, W = 2, 4, 16, 16       # input:  (2, 4, 16, 16)  NCHW
    Cout = 8                          # FCU(inplanes=4, outplanes=8)

    x = jax.random.normal(k_x, (N, Cin, H, W), dtype=jnp.float32)
    # Deterministic synthetic parameters (shapes from the module's __init__).
    w = jax.random.normal(k_w, (Cout, Cin), dtype=jnp.float32) * 0.5   # conv weight (1x1)
    b = jax.random.normal(k_b, (Cout,), dtype=jnp.float32) * 0.1       # conv bias
    gamma = 1.0 + 0.1 * jax.random.normal(k_g, (Cout,), dtype=jnp.float32)  # BN weight
    beta = 0.1 * jax.random.normal(k_beta, (Cout,), dtype=jnp.float32)      # BN bias

    out = jax.jit(fcu_forward)(x, w, b, gamma, beta)
    out = jax.block_until_ready(out)

    ref = fcu_reference(x, w, b, gamma, beta)
    assert out.shape == (N, Cout, H, W)
    assert jnp.allclose(out, ref, atol=1e-4, rtol=1e-4), "mismatch vs reference"

    print("KERNEL_OK")
</pallas_src>

<mosaic_0001>
module attributes {stable_mosaic.version = 11 : i64} {
  func.func @stats_kernel(%arg0: i32, %arg1: i32, %arg2: memref<1x4x256xf32, #tpu.memory_space<vmem>>, %arg3: memref<8x4xf32, #tpu.memory_space<vmem>>, %arg4: memref<8x1xf32, #tpu.memory_space<vmem>>, %arg5: memref<8x1xf32, #tpu.memory_space<vmem>>) attributes {dimension_semantics = [#tpu.dimension_semantics<arbitrary>, #tpu.dimension_semantics<arbitrary>], iteration_bounds = array<i64: 2, 1>, scalar_prefetch = 0 : i64, scratch_operands = 0 : i64, tpu.core_type = #tpu.core_type<tc>, window_params = [{transform_indices = @transform_0, window_bounds = array<i64: 1, 4, 256>}, {pipeline_mode = #tpu.pipeline_mode<synchronous>, transform_indices = @transform_1, window_bounds = array<i64: 8, 4>}, {pipeline_mode = #tpu.pipeline_mode<synchronous>, transform_indices = @transform_2, window_bounds = array<i64: 8, 1>}, {pipeline_mode = #tpu.pipeline_mode<synchronous>, transform_indices = @transform_3, window_bounds = array<i64: 8, 1>}]} {
    %c0_i32 = arith.constant 0 : i32
    %0 = arith.cmpi eq, %arg0, %c0_i32 : i32
    %c0_i32_0 = arith.constant 0 : i32
    %1 = arith.cmpi eq, %arg1, %c0_i32_0 : i32
    %2 = arith.andi %0, %1 : i1
    %3 = arith.extui %2 : i1 to i32
    %c0_i32_1 = arith.constant 0 : i32
    %4 = arith.cmpi ne, %3, %c0_i32_1 : i32
    scf.if %4 {
      %cst_16 = arith.constant 0.000000e+00 : f32
      %20 = vector.broadcast %cst_16 : f32 to vector<8x1xf32>
      %c0_17 = arith.constant 0 : index
      %c0_18 = arith.constant 0 : index
      %21 = vector.load %arg4[%c0_17, %c0_18] : memref<8x1xf32, #tpu.memory_space<vmem>>, vector<8x1xf32>
      tpu.vector_store %arg4[%c0_17, %c0_18], %20 {strides = array<i32>} : memref<8x1xf32, #tpu.memory_space<vmem>>, vector<8x1xf32>,
      %cst_19 = arith.constant 0.000000e+00 : f32
      %22 = vector.broadcast %cst_19 : f32 to vector<8x1xf32>
      %c0_20 = arith.constant 0 : index
      %c0_21 = arith.constant 0 : index
      %23 = vector.load %arg5[%c0_20, %c0_21] : memref<8x1xf32, #tpu.memory_space<vmem>>, vector<8x1xf32>
      tpu.vector_store %arg5[%c0_20, %c0_21], %22 {strides = array<i32>} : memref<8x1xf32, #tpu.memory_space<vmem>>, vector<8x1xf32>,
    } else {
    }
    %c0 = arith.constant 0 : index
    %c0_2 = arith.constant 0 : index
    %5 = vector.load %arg3[%c0, %c0_2] : memref<8x4xf32, #tpu.memory_space<vmem>>, vector<8x4xf32>
    %c0_3 = arith.constant 0 : index
    %c0_4 = arith.constant 0 : index
    %c0_5 = arith.constant 0 : index
    %6 = vector.load %arg2[%c0_3, %c0_4, %c0_5] : memref<1x4x256xf32, #tpu.memory_space<vmem>>, vector<1x4x256xf32>
    %7 = vector.shape_cast %6 : vector<1x4x256xf32> to vector<4x256xf32>
    %cst = arith.constant dense<0.000000e+00> : vector<8x256xf32>
    %8 = tpu.matmul %5, %7, %cst {dimension_numbers = #tpu.dot_dimension_numbers<[1], [0], [0], [1], [0, 0, 1, 1], [], []>} : vector<8x4xf32>, vector<4x256xf32>, vector<8x256xf32> -> vector<8x256xf32>
    %c0_6 = arith.constant 0 : index
    %c0_7 = arith.constant 0 : index
    %9 = vector.load %arg4[%c0_6, %c0_7] : memref<8x1xf32, #tpu.memory_space<vmem>>, vector<8x1xf32>
    %cst_8 = arith.constant dense<0.000000e+00> : vector<8xf32>
    %10 = vector.multi_reduction <add>, %8, %cst_8 [1] : vector<8x256xf32> to vector<8xf32>
    %11 = vector.shape_cast %10 : vector<8xf32> to vector<8x1xf32>
    %12 = arith.addf %9, %11 : vector<8x1xf32>
    %c0_9 = arith.constant 0 : index
    %c0_10 = arith.constant 0 : index
    %13 = vector.load %arg4[%c0_9, %c0_10] : memref<8x1xf32, #tpu.memory_space<vmem>>, vector<8x1xf32>
    tpu.vector_store %arg4[%c0_9, %c0_10], %12 {strides = array<i32>} : memref<8x1xf32, #tpu.memory_space<vmem>>, vector<8x1xf32>,
    %c0_11 = arith.constant 0 : index
    %c0_12 = arith.constant 0 : index
    %14 = vector.load %arg5[%c0_11, %c0_12] : memref<8x1xf32, #tpu.memory_space<vmem>>, vector<8x1xf32>
    %15 = arith.mulf %8, %8 : vector<8x256xf32>
    %cst_13 = arith.constant dense<0.000000e+00> : vector<8xf32>
    %16 = vector.multi_reduction <add>, %15, %cst_13 [1] : vector<8x256xf32> to vector<8xf32>
    %17 = vector.shape_cast %16 : vector<8xf32> to vector<8x1xf32>
    %18 = arith.addf %14, %17 : vector<8x1xf32>
    %c0_14 = arith.constant 0 : index
    %c0_15 = arith.constant 0 : index
    %19 = vector.load %arg5[%c0_14, %c0_15] : memref<8x1xf32, #tpu.memory_space<vmem>>, vector<8x1xf32>
    tpu.vector_store %arg5[%c0_14, %c0_15], %18 {strides = array<i32>} : memref<8x1xf32, #tpu.memory_space<vmem>>, vector<8x1xf32>,
    return
  }
  func.func @transform_0(%arg0: i32, %arg1: i32) -> (i32, i32, i32) {
    %c0_i32 = arith.constant 0 : i32
    %c0_i32_0 = arith.constant 0 : i32
    return %arg0, %c0_i32, %arg1 : i32, i32, i32
  }
  func.func @transform_1(%arg0: i32, %arg1: i32) -> (i32, i32) {
    %c0_i32 = arith.constant 0 : i32
    %c0_i32_0 = arith.constant 0 : i32
    %c0_i32_1 = arith.constant 0 : i32
    return %c0_i32, %c0_i32_0 : i32, i32
  }
  func.func @transform_2(%arg0: i32, %arg1: i32) -> (i32, i32) {
    %c0_i32 = arith.constant 0 : i32
    %c0_i32_0 = arith.constant 0 : i32
    %c0_i32_1 = arith.constant 0 : i32
    return %c0_i32, %c0_i32_0 : i32, i32
  }
  func.func @transform_3(%arg0: i32, %arg1: i32) -> (i32, i32) {
    %c0_i32 = arith.constant 0 : i32
    %c0_i32_0 = arith.constant 0 : i32
    %c0_i32_1 = arith.constant 0 : i32
    return %c0_i32, %c0_i32_0 : i32, i32
  }
}

module attributes {stable_mosaic.version = 11 : i64} {
  func.func @conv_bn_relu_kernel(%arg0: i32, %arg1: i32, %arg2: memref<1x4x256xf32, #tpu.memory_space<vmem>>, %arg3: memref<8x4xf32, #tpu.memory_space<vmem>>, %arg4: memref<8x1xf32, #tpu.memory_space<vmem>>, %arg5: memref<8x1xf32, #tpu.memory_space<vmem>>, %arg6: memref<1x8x256xf32, #tpu.memory_space<vmem>>) attributes {dimension_semantics = [#tpu.dimension_semantics<parallel>, #tpu.dimension_semantics<parallel>], iteration_bounds = array<i64: 2, 1>, scalar_prefetch = 0 : i64, scratch_operands = 0 : i64, tpu.core_type = #tpu.core_type<tc>, window_params = [{transform_indices = @transform_0, window_bounds = array<i64: 1, 4, 256>}, {pipeline_mode = #tpu.pipeline_mode<synchronous>, transform_indices = @transform_1, window_bounds = array<i64: 8, 4>}, {pipeline_mode = #tpu.pipeline_mode<synchronous>, transform_indices = @transform_2, window_bounds = array<i64: 8, 1>}, {pipeline_mode = #tpu.pipeline_mode<synchronous>, transform_indices = @transform_3, window_bounds = array<i64: 8, 1>}, {transform_indices = @transform_4, window_bounds = array<i64: 1, 8, 256>}]} {
    %c0 = arith.constant 0 : index
    %c0_0 = arith.constant 0 : index
    %0 = vector.load %arg3[%c0, %c0_0] : memref<8x4xf32, #tpu.memory_space<vmem>>, vector<8x4xf32>
    %c0_1 = arith.constant 0 : index
    %c0_2 = arith.constant 0 : index
    %c0_3 = arith.constant 0 : index
    %1 = vector.load %arg2[%c0_1, %c0_2, %c0_3] : memref<1x4x256xf32, #tpu.memory_space<vmem>>, vector<1x4x256xf32>
    %2 = vector.shape_cast %1 : vector<1x4x256xf32> to vector<4x256xf32>
    %cst = arith.constant dense<0.000000e+00> : vector<8x256xf32>
    %3 = tpu.matmul %0, %2, %cst {dimension_numbers = #tpu.dot_dimension_numbers<[1], [0], [0], [1], [0, 0, 1, 1], [], []>} : vector<8x4xf32>, vector<4x256xf32>, vector<8x256xf32> -> vector<8x256xf32>
    %c0_4 = arith.constant 0 : index
    %c0_5 = arith.constant 0 : index
    %4 = vector.load %arg4[%c0_4, %c0_5] : memref<8x1xf32, #tpu.memory_space<vmem>>, vector<8x1xf32>
    %5 = vector.broadcast %4 : vector<8x1xf32> to vector<8x256xf32>
    %6 = arith.mulf %3, %5 : vector<8x256xf32>
    %c0_6 = arith.constant 0 : index
    %c0_7 = arith.constant 0 : index
    %7 = vector.load %arg5[%c0_6, %c0_7] : memref<8x1xf32, #tpu.memory_space<vmem>>, vector<8x1xf32>
    %8 = vector.broadcast %7 : vector<8x1xf32> to vector<8x256xf32>
    %9 = arith.addf %6, %8 : vector<8x256xf32>
    %cst_8 = arith.constant 0.000000e+00 : f32
    %10 = vector.broadcast %cst_8 : f32 to vector<8x256xf32>
    %11 = arith.maximumf %9, %10 : vector<8x256xf32>
    %c0_9 = arith.constant 0 : index
    %c0_10 = arith.constant 0 : index
    %c0_11 = arith.constant 0 : index
    %12 = vector.load %arg6[%c0_9, %c0_10, %c0_11] : memref<1x8x256xf32, #tpu.memory_space<vmem>>, vector<1x8x256xf32>
    %13 = vector.shape_cast %12 : vector<1x8x256xf32> to vector<8x256xf32>
    %14 = vector.shape_cast %11 : vector<8x256xf32> to vector<1x8x256xf32>
    tpu.vector_store %arg6[%c0_9, %c0_10, %c0_11], %14 {strides = array<i32>} : memref<1x8x256xf32, #tpu.memory_space<vmem>>, vector<1x8x256xf32>,
    return
  }
  func.func @transform_0(%arg0: i32, %arg1: i32) -> (i32, i32, i32) {
    %c0_i32 = arith.constant 0 : i32
    %c0_i32_0 = arith.constant 0 : i32
    return %arg0, %c0_i32, %arg1 : i32, i32, i32
  }
  func.func @transform_1(%arg0: i32, %arg1: i32) -> (i32, i32) {
    %c0_i32 = arith.constant 0 : i32
    %c0_i32_0 = arith.constant 0 : i32
    %c0_i32_1 = arith.constant 0 : i32
    return %c0_i32, %c0_i32_0 : i32, i32
  }
  func.func @transform_2(%arg0: i32, %arg1: i32) -> (i32, i32) {
    %c0_i32 = arith.constant 0 : i32
    %c0_i32_0 = arith.constant 0 : i32
    %c0_i32_1 = arith.constant 0 : i32
    return %c0_i32, %c0_i32_0 : i32, i32
  }
  func.func @transform_3(%arg0: i32, %arg1: i32) -> (i32, i32) {
    %c0_i32 = arith.constant 0 : i32
    %c0_i32_0 = arith.constant 0 : i32
    %c0_i32_1 = arith.constant 0 : i32
    return %c0_i32, %c0_i32_0 : i32, i32
  }
  func.func @transform_4(%arg0: i32, %arg1: i32) -> (i32, i32, i32) {
    %c0_i32 = arith.constant 0 : i32
    %c0_i32_0 = arith.constant 0 : i32
    return %arg0, %c0_i32, %arg1 : i32, i32, i32
  }
}

</mosaic_0001>

<bundles_post_ra>
// kernel: fcu_forward.2
= control target key start
LH: loop header
LB: loop body
LE: loop exit
PB: predicated region body
PF: predicated region fallthrough
CT: control target
= control target key end

     0   :  { %s425_s12 = smov 0   ;;  %s427_s13 = smov 0   ;;  %s476_s0 = inlined_call_operand.vmem [shape: f32[2,4,256], index: 0, kind: input, shape index: {}]   ;;  %s477_s1 = inlined_call_operand.vmem [shape: f32[8,4], index: 1, kind: input, shape index: {}]   ;;  %s478_s2 = inlined_call_operand.vmem [shape: f32[8,1], index: 2, kind: output, shape index: {0}]   ;;  %s479_s3 = inlined_call_operand.vmem [shape: f32[8,1], index: 3, kind: output, shape index: {1}]  }
   0x1   :  { %s429_s14 = smov 0  }
   0x2 LB: > { %s26_s15 = sadd.s32 1, %s397_s13  ;;  %p341_p0 = scmp.ge.s32.totalorder %s401_s14, 1  ;;  %s401_s14 = sphi %s429_s14, %s14_s14   ;;  %s397_s13 = sphi %s427_s13, %s481_s13   ;;  %s393_s12 = sphi %s425_s12, %s480_s12  }
   0x3   : > { %p28_p1 = scmp.ge.s32.totalorder %s26_s15, 2  ;;  %p149_p2 = scmp.lt.s32.totalorder %s401_s14, 3 }
   0x5   : > { %s483_s15 = smov (%p28_p1, %s26_s15), 0  ;;  %p150_p3 = pnand %p341_p0, %p149_p2 }
   0x6   : > { %p173_p4 = scmp.lt.s32.totalorder (!%p150_p3), %s393_s12, 1  ;;  %p182_p5 = scmp.eq.s32.totalorder (!%p150_p3), %s393_s12, 0 }
   0x7   : > { %153 = sbr.rel (%p150_p3) target bundleno = 390 (0x186), region = 28 }
   0xe   : > { %s485_s12 = smov (!%p173_p4, %s393_s12), 1  ;;  %187 = sbr.rel (!%p182_p5) target bundleno = 21 (0x15), region = 32 }
   0xf   : > { %s350_s16 = sshll.u32 %s485_s12, 3  ;;  %vm188_vm0 = vcmask (%p182_p5), 7168   ;;  %v403_v0 = vmov (%p182_p5), 0.0  }
  0x10   : > { %s180_s19 = scalar_lea.vmem %s476_s0, %s350_s16  ;;  %189 = vst.msk [vmem:[%s478_s2] sm:$0xff] (%p182_p5), %vm188_vm0, %v403_v0  ;;  %190 = vst.msk [vmem:[%s479_s3] sm:$0xff] (%p182_p5), %vm188_vm0, %v403_v0 }
  0x15 PF: > { %v192_v1 = vld [vmem:[%s180_s19] sm:$0xff]  ;;  %vm199_vm1 = vcmask 1043456   ;;  %v404_v3 = vmov 0.0   ;;  %vm195_vm2 = vcmask 31744   ;;  %vm280_vm3 = vcmask 7168  }
  0x16   : > { %v194_v2 = vcombine.high %v192_v1, %v192_v1  ;;  %268 = vmatprep.mubr.f32.mxu0 %v404_v3  ;;  %v191_v4 = vld [vmem:[%s477_s1] sm:$0xff] }
  0x17   : > { %v275_v11 = vld [vmem:[%s478_s2] sm:$0xff] }
  0x18   : > { %345 = vmatprep.subr.msk.mxu0 %vm199_vm1, %v194_v2  ;;  %v282_v14 = vld [vmem:[%s479_s3] sm:$0xff] }
  0x19   : > { %346 = vmatpush1.msk.msra.mxu0 %vm199_vm1, %v192_v1 }
  0x1a   : > { %347 = vmatmul.mubr.msk.f32.vlgmr.msra.gmra.mrb[0].mxu0 %vm195_vm2, %v191_v4 }
  0xed   : > { %v270_v5 = vpop.f32.mrb[0].mxu0 }
  0xee   : > { %v283_v6 = vmul.f32 %v270_v5, %v270_v5  ;;  %v272_v7 = vpop.f32.mrb[1].mxu0 }
  0xef   : > { %v284_v8 = vmul.f32 %v272_v7, %v272_v7  ;;  %v276_v9 = vadd.f32 %v272_v7, %v270_v5 }
  0xf1   : > { %277 = vadd.xlane.f32.xlu0 %v276_v9  ;;  %v285_v10 = vadd.f32 %v284_v8, %v283_v6 }
  0xf5   : > { %286 = vadd.xlane.f32.xlu0 %v285_v10 }
 0x17e   : > { %v278_v12 = vpop.xlane.xlu0 %277 }
 0x17f   : > { %v279_v13 = vadd.f32 %v278_v12, %v275_v11 }
 0x181   : > { %281 = vst.msk [vmem:[%s478_s2] sm:$0xff] %vm280_vm3, %v279_v13 }
 0x182   : > { %v287_v15 = vpop.xlane.xlu0 %286 }
 0x183   : > { %v288_v16 = vadd.f32 %v287_v15, %v282_v14 }
 0x185   : > { %289 = vst.msk [vmem:[%s479_s3] sm:$0xff] %vm280_vm3, %v288_v16 }
 0x186 PF: > { %s14_s14 = sadd.s32 1, %s401_s14   ;;  %s480_s12 = smov %s397_s13 }
 0x187   : > { %p11_p6 = scmp.ge.s32.totalorder %s14_s14, 4   ;;  %s481_s13 = smov %s483_s15 }
 0x189   :  { %13 = sbr.rel (!%p11_p6) target bundleno = 2 (0x2), region = 66 }

// kernel: fcu_forward.3
= control target key start
LH: loop header
LB: loop body
LE: loop exit
PB: predicated region body
PF: predicated region fallthrough
CT: control target
= control target key end

     0   :  { %s523_s15 = smov 0   ;;  %s525_s16 = smov 0   ;;  %s565_s0 = inlined_call_operand.vmem [shape: f32[2,4,256], index: 0, kind: input, shape index: {}]   ;;  %s566_s1 = inlined_call_operand.vmem [shape: f32[8,4], index: 1, kind: input, shape index: {}]   ;;  %s567_s2 = inlined_call_operand.vmem [shape: f32[8,1], index: 2, kind: input, shape index: {}]   ;;  %s568_s3 = inlined_call_operand.vmem [shape: f32[8,1], index: 3, kind: input, shape index: {}]   ;;  %s569_s4 = inlined_call_operand.vmem [shape: f32[2,8,256], index: 4, kind: output, shape index: {}]  }
   0x1   :  { %s527_s17 = smov 0  }
   0x2 LB: > { %s26_s18 = sadd.s32 1, %s490_s16  ;;  %p432_p0 = scmp.ge.s32.totalorder %s494_s17, 1  ;;  %s494_s17 = sphi %s527_s17, %s14_s17   ;;  %s490_s16 = sphi %s525_s16, %s571_s16   ;;  %s486_s15 = sphi %s523_s15, %s570_s15  }
   0x3   : > { %p28_p1 = scmp.ge.s32.totalorder %s26_s18, 2  ;;  %p183_p2 = scmp.lt.s32.totalorder %s494_s17, 3 }
   0x5   : > { %s573_s18 = smov (%p28_p1, %s26_s18), 0  ;;  %p184_p3 = pnand %p432_p0, %p183_p2 }
   0x6   : > { %p218_p4 = scmp.lt.s32.totalorder (!%p184_p3), %s486_s15, 1  ;;  %v496_v0 = vmov (!%p184_p3), 0.0   ;;  %v497_v1 = vmov (!%p184_p3), 0   ;;  %v321_v2 = vld [vmem:[%s567_s2] sm:$0xff] (!%p184_p3)  ;;  %vm245_vm0 = vcmask (!%p184_p3), 1043456   ;;  %vm241_vm1 = vcmask (!%p184_p3), 31744  }
   0x7   : > { %187 = sbr.rel (%p184_p3) target bundleno = 242 (0xf2), region = 36  ;;  %314 = vmatprep.mubr.f32.mxu0 (!%p184_p3), %v496_v0  ;;  %470 = vset.pattern.permute.xlu0 (!%p184_p3), %v497_v1  ;;  %v329_v3 = vld [vmem:[%s568_s3] sm:$0xff] (!%p184_p3) }
   0x8   : > { %324 = vperm.xlu0 (!%p184_p3), %470, %v321_v2   ;;  %v237_v6 = vld [vmem:[%s566_s1] sm:$0xff] (!%p184_p3) }
   0xc   : > { %332 = vperm.xlu0 (!%p184_p3), %470, %v329_v3  }
   0xe   : > { %s575_s15 = smov (!%p218_p4, %s486_s15), 1 }
   0xf   : > { %s442_s23 = sshll.u32 %s575_s15, 3  ;;  %s443_s29 = sshll.u32 %s575_s15, 4 }
  0x10   : > { %s225_s26 = scalar_lea.vmem %s565_s0, %s442_s23  ;;  %s235_s6 = scalar_lea.vmem %s569_s4, %s443_s29 }
  0x11   : > { %v238_v4 = vld [vmem:[%s225_s26] sm:$0xff] }
  0x12   : > { %v240_v5 = vcombine.high %v238_v4, %v238_v4 }
  0x14   : > { %437 = vmatprep.subr.msk.mxu0 %vm245_vm0, %v240_v5 }
  0x15   : > { %438 = vmatpush1.msk.msra.mxu0 %vm245_vm0, %v238_v4 }
  0x16   : > { %439 = vmatmul.mubr.msk.f32.vlgmr.msra.gmra.mrb[0].mxu0 %vm241_vm1, %v237_v6 }
  0x87   : > { %v325_v7 = vpop.permute.xlu0 %324 }
  0x8b   : > { %v333_v11 = vpop.permute.xlu0 %332 }
  0xe9   : > { %v316_v8 = vpop.f32.mrb[0].mxu0 }
  0xea   : > { %v327_v9 = vmul.f32 %v325_v7, %v316_v8  ;;  %v318_v10 = vpop.f32.mrb[1].mxu0 }
  0xeb   : > { %v328_v12 = vmul.f32 %v325_v7, %v318_v10 }
  0xec   : > { %v335_v13 = vadd.f32 %v333_v11, %v327_v9 }
  0xed   : > { %v336_v14 = vadd.f32 %v333_v11, %v328_v12 }
  0xee   : > { %v337_v15 = vmax.f32 %v335_v13, 0.0 }
  0xef   : > { %v338_v16 = vmax.f32 %v336_v14, 0.0 }
  0xf0   : > { %339 = vst [vmem:[%s235_s6] sm:$0xff] %v337_v15 }
  0xf1   : > { %340 = vst [vmem:[%s235_s6 + $0x8] sm:$0xff] %v338_v16 }
  0xf2 PF: > { %s14_s17 = sadd.s32 1, %s494_s17   ;;  %s570_s15 = smov %s490_s16 }
  0xf3   : > { %p11_p5 = scmp.ge.s32.totalorder %s14_s17, 4   ;;  %s571_s16 = smov %s573_s18 }
  0xf5   :  { %13 = sbr.rel (!%p11_p5) target bundleno = 2 (0x2), region = 66 }

</bundles_post_ra>
